<compile_context>
chip_gen: v7x
topology: tpu7x:2x2x1
jax: 0.10.0
libtpu: 0.0.40
codegen_flags: <defaults>
</compile_context>

<pallas_src>
import functools

import jax
import jax.numpy as jnp
from jax.experimental import pallas as pl
from jax.experimental.pallas import tpu as pltpu


def _loss_kernel(slab_ref, pts_ref, out_ref, *, alpha, beta, gamma, power,
                 plane_dist, n_dim, n_batch, m_per_b, bm, bp, br, lanes):
    f32 = jnp.float32
    lane = jax.lax.broadcasted_iota(jnp.int32, (1, lanes), 1)

    def row(r):
        # Static single-row slice -> lane-dense (1, lanes) vector.
        return slab_ref[r:r + 1, :].astype(f32)

    # slab row layout:
    #   [0:N]       inter_pos      [N:2N]      inter_grad
    #   [2N]        ray_dists      [2N+1]      inter_val
    #   [2N+2]      points_distance
    #   [2N+3:3N+3] rand_grad g0   [3N+3:4N+3] rand_grad g1
    r_ip, r_ig = 0, n_dim
    r_rd, r_iv = 2 * n_dim, 2 * n_dim + 1
    r_pd = 2 * n_dim + 2
    r_g0, r_g1 = 2 * n_dim + 3, 3 * n_dim + 3

    rd = row(r_rd)                                   # (1, lanes)
    iv = row(r_iv)                                   # (1, lanes)

    # ---- projected plane distance ------------------------------------------
    if plane_dist:
        dot_acc = None                               # sum_n ig_n * (ip_n - pt_n)
        sq_acc = None                                # sum_n ig_n^2
        for n in range(n_dim):                       # N tiny: unrolled VPU FMAs
            ip_n = row(r_ip + n)
            ig_n = row(r_ig + n)
            # per-lane points value: SMEM scalar broadcast + banded selects
            pt_n = jnp.full((1, lanes), pts_ref[0, n], dtype=f32)
            for b in range(1, n_batch):
                pt_n = jnp.where(lane >= b * m_per_b, pts_ref[b, n], pt_n)
            d_n = ip_n - pt_n
            td = ig_n * d_n
            ts = ig_n * ig_n
            dot_acc = td if dot_acc is None else dot_acc + td
            sq_acc = ts if sq_acc is None else sq_acc + ts
        # proj = dot / max(||ig||, 1e-12)  ==  dot * min(rsqrt(||ig||^2), 1e12)
        inv_norm = jnp.minimum(jax.lax.rsqrt(sq_acc), 1e12)
        dist = jnp.sqrt(jnp.abs(dot_acc * inv_norm))  # zero on padded lanes
    else:
        dist = rd

    # ---- weighted L1 intersection loss --------------------------------------
    l1 = jnp.abs(iv - dist)                          # exact zero on padded lanes
    if power == 0:
        # weight == 1 exactly: skip max / pow / sum / renormalization.
        inter_loss = jnp.sum(l1) * (1.0 / bm)
    else:
        valid_m = lane < bm
        rd_mx = jnp.max(jnp.where(valid_m, rd, -jnp.inf))
        w = (0.001 + rd_mx - rd) ** power
        w = jnp.where(valid_m, w, 0.0)
        w = w * (float(bm) / jnp.sum(w))
        inter_loss = jnp.sum(l1 * w) * (1.0 / bm)

    # ---- |points_distance| mean (padded lanes contribute exact zeros) -------
    loss_distance = jnp.sum(jnp.abs(row(r_pd))) * (1.0 / bp)

    # ---- rand_grad norm & cosine terms ---------------------------------------
    s0 = s1 = d01 = None
    for n in range(n_dim):
        g0n = row(r_g0 + n)
        g1n = row(r_g1 + n)
        a0 = g0n * g0n
        a1 = g1n * g1n
        c01 = g0n * g1n
        s0 = a0 if s0 is None else s0 + a0
        s1 = a1 if s1 is None else s1 + a1
        d01 = c01 if d01 is None else d01 + c01
    gterm = jnp.abs(jnp.sqrt(s0) - 1.0) + jnp.abs(jnp.sqrt(s1) - 1.0)
    # cos = dot / max(n0*n1, 1e-8)  ==  dot * min(rsqrt(s0)*rsqrt(s1), 1e8)
    # (two rsqrt instead of rsqrt(s0*s1) to avoid overflow of the product)
    inv01 = jnp.minimum(jax.lax.rsqrt(s0) * jax.lax.rsqrt(s1), 1e8)
    simterm = 1.0 - d01 * inv01
    if lanes > br:
        # padded lanes would contribute |0-1|*2 and (1-0): mask them out.
        valid_r = lane < br
        gterm = jnp.where(valid_r, gterm, 0.0)
        simterm = jnp.where(valid_r, simterm, 0.0)
    loss_gradient = jnp.sum(gterm) * (1.0 / (2 * br))
    grad_sim = jnp.sum(simterm) * (1.0 / br)

    loss = (inter_loss + alpha * loss_gradient + beta * loss_distance
            + gamma * grad_sim)

    # ---- single lane-dense output: [loss, inter, dist, grad, sim, 0...] -----
    out_lane = jax.lax.broadcasted_iota(jnp.int32, out_ref.shape, 1)
    vals = jnp.zeros(out_ref.shape, f32)
    vals = jnp.where(out_lane == 0, loss, vals)
    vals = jnp.where(out_lane == 1, inter_loss, vals)
    vals = jnp.where(out_lane == 2, loss_distance, vals)
    vals = jnp.where(out_lane == 3, loss_gradient, vals)
    vals = jnp.where(out_lane == 4, grad_sim, vals)
    out_ref[...] = vals


def projected_distance_loss(points_distance, points, ray_dists, inter_val,
                            inter_pos, inter_grad, rand_grad,
                            alpha=0.1, beta=0.1, gamma=0.1, power=0,
                            plane_dist=True):
    B, M, N = inter_pos.shape
    P = points_distance.shape[1]
    R = rand_grad.shape[1]
    bm, bp, br = B * M, B * P, B * R
    lanes = max(128, ((max(bm, bp, br) + 127) // 128) * 128)
    f32 = jnp.float32

    # Keep the inputs' common dtype in the slab (no wrapper up-cast; rows are
    # cast to f32 inside the kernel, so bf16 inputs halve DMA bytes for free).
    pack_dtype = jnp.result_type(points_distance, ray_dists, inter_val,
                                 inter_pos, inter_grad, rand_grad)

    def pad_lanes(x):
        x = x.astype(pack_dtype)
        return jnp.pad(x, ((0, 0), (0, lanes - x.shape[1])))

    # ---- layout plumbing only (transpose / reshape / pad / concat, no math) --
    # With allow_input_fusion these producers can fuse into the custom call.
    ip_t = jnp.transpose(inter_pos, (2, 0, 1)).reshape(N, bm)
    ig_t = jnp.transpose(inter_grad, (2, 0, 1)).reshape(N, bm)
    rd_t = ray_dists.reshape(1, bm)
    iv_t = inter_val.reshape(1, bm)
    pd_t = points_distance.reshape(1, bp)
    rg_t = jnp.transpose(rand_grad, (2, 3, 0, 1)).reshape(2 * N, br)
    slab = jnp.concatenate([pad_lanes(ip_t), pad_lanes(ig_t), pad_lanes(rd_t),
                            pad_lanes(iv_t), pad_lanes(pd_t), pad_lanes(rg_t)],
                           axis=0)                          # (4N+3, lanes)
    pts = points.astype(f32)                                # (B, N) SMEM scalars

    kernel = functools.partial(
        _loss_kernel, alpha=float(alpha), beta=float(beta), gamma=float(gamma),
        power=power, plane_dist=plane_dist, n_dim=N, n_batch=B, m_per_b=M,
        bm=bm, bp=bp, br=br, lanes=lanes)

    slab_bytes = int(slab.size) * slab.dtype.itemsize
    cost = pl.CostEstimate(
        flops=int(30 * bm + 20 * br + 2 * bp + 64),
        transcendentals=int(2 * bm + 3 * br),
        bytes_accessed=int(slab_bytes + pts.size * 4 + 512))

    out = pl.pallas_call(
        kernel,
        out_shape=jax.ShapeDtypeStruct((1, 128), f32),
        in_specs=[pl.BlockSpec(memory_space=pltpu.MemorySpace.VMEM),
                  pl.BlockSpec(memory_space=pltpu.MemorySpace.SMEM)],
        out_specs=pl.BlockSpec(memory_space=pltpu.MemorySpace.VMEM),
        compiler_params=pltpu.CompilerParams(
            allow_input_fusion=[True, False]),
        cost_estimate=cost,
    )(slab, pts)

    loss = out[0, 0]
    logs = {'distance': out[0, 2], 'l1_dist': out[0, 1],
            'gradient': out[0, 3], 'gradient_sim': out[0, 4], 'loss': loss}
    return loss, logs


def _reference(points_distance, points, ray_dists, inter_val, inter_pos,
               inter_grad, rand_grad, alpha=0.1, beta=0.1, gamma=0.1, power=0,
               plane_dist=True):
    if plane_dist:
        d_pos = inter_pos - points[:, None, :]
        ig_n = inter_grad / jnp.maximum(
            jnp.linalg.norm(inter_grad, axis=-1, keepdims=True), 1e-12)
        dist = jnp.sqrt(jnp.abs(jnp.einsum('...n,...n->...', ig_n, d_pos)))[..., None]
    else:
        dist = ray_dists
    w = (0.001 + jnp.max(ray_dists) - ray_dists) ** power
    w = w * (w.size / jnp.sum(w))
    inter_loss = jnp.mean(jnp.abs(inter_val - dist) * w)
    loss_distance = jnp.mean(jnp.abs(points_distance))
    loss_gradient = jnp.mean(jnp.abs(jnp.linalg.norm(rand_grad, axis=-1) - 1.0))
    g0, g1 = rand_grad[..., 0, :], rand_grad[..., 1, :]
    cos = jnp.sum(g0 * g1, -1) / jnp.maximum(
        jnp.linalg.norm(g0, axis=-1) * jnp.linalg.norm(g1, axis=-1), 1e-8)
    grad_sim = jnp.mean(1.0 - cos)
    loss = inter_loss + alpha * loss_gradient + beta * loss_distance + gamma * grad_sim
    return loss, {'distance': loss_distance, 'l1_dist': inter_loss,
                  'gradient': loss_gradient, 'gradient_sim': grad_sim, 'loss': loss}


if __name__ == "__main__":
    B, M, P, R, N = 2, 16, 16, 8, 3
    key = jax.random.PRNGKey(0)
    k = jax.random.split(key, 7)
    points_distance = jax.random.normal(k[0], (B, P, 1), jnp.float32)
    points = jax.random.normal(k[1], (B, N), jnp.float32)
    ray_dists = jnp.abs(jax.random.normal(k[2], (B, M, 1), jnp.float32))
    inter_val = jax.random.normal(k[3], (B, M, 1), jnp.float32)
    inter_pos = jax.random.normal(k[4], (B, M, N), jnp.float32)
    inter_grad = jax.random.normal(k[5], (B, M, N), jnp.float32)
    rand_grad = jax.random.normal(k[6], (B, R, 2, N), jnp.float32)

    loss, logs = projected_distance_loss(
        points_distance, points, ray_dists, inter_val, inter_pos, inter_grad,
        rand_grad)
    jax.block_until_ready(loss)

    ref_loss, ref_logs = _reference(points_distance, points, ray_dists,
                                    inter_val, inter_pos, inter_grad, rand_grad)
    assert jnp.allclose(loss, ref_loss, rtol=1e-3, atol=1e-3), (loss, ref_loss)
    for name in ('distance', 'l1_dist', 'gradient', 'gradient_sim', 'loss'):
        assert jnp.allclose(logs[name], ref_logs[name], rtol=1e-3, atol=1e-3), (
            name, logs[name], ref_logs[name])
    print("KERNEL_OK")
</pallas_src>

<mosaic_0001>
module attributes {stable_mosaic.version = 11 : i64} {
  func.func @_loss_kernel(%arg0: memref<15x128xf32, #tpu.memory_space<vmem>>, %arg1: memref<2x3xf32, #tpu.memory_space<smem>>, %arg2: memref<1x128xf32, #tpu.memory_space<vmem>>) attributes {dimension_semantics = [], scalar_prefetch = 0 : i64, scratch_operands = 0 : i64, tpu.core_type = #tpu.core_type<tc>} {
    %0 = tpu.iota {dimensions = array<i32: 1>} : vector<1x128xi32>
    %c7 = arith.constant 7 : index
    %c0 = arith.constant 0 : index
    %1 = vector.load %arg0[%c7, %c0] : memref<15x128xf32, #tpu.memory_space<vmem>>, vector<1x128xf32>
    %c0_0 = arith.constant 0 : index
    %c0_1 = arith.constant 0 : index
    %2 = vector.load %arg0[%c0_0, %c0_1] : memref<15x128xf32, #tpu.memory_space<vmem>>, vector<1x128xf32>
    %c3 = arith.constant 3 : index
    %c0_2 = arith.constant 0 : index
    %3 = vector.load %arg0[%c3, %c0_2] : memref<15x128xf32, #tpu.memory_space<vmem>>, vector<1x128xf32>
    %c0_3 = arith.constant 0 : index
    %c0_4 = arith.constant 0 : index
    %4 = memref.load %arg1[%c0_3, %c0_4] : memref<2x3xf32, #tpu.memory_space<smem>>
    %5 = vector.broadcast %4 : f32 to vector<1x128xf32>
    %c16_i32 = arith.constant 16 : i32
    %6 = vector.broadcast %c16_i32 : i32 to vector<1x128xi32>
    %7 = arith.cmpi sge, %0, %6 : vector<1x128xi32>
    %c1 = arith.constant 1 : index
    %c0_5 = arith.constant 0 : index
    %8 = memref.load %arg1[%c1, %c0_5] : memref<2x3xf32, #tpu.memory_space<smem>>
    %9 = vector.broadcast %8 : f32 to vector<1x128xf32>
    %10 = arith.select %7, %9, %5 : vector<1x128xi1>, vector<1x128xf32>
    %11 = arith.subf %2, %10 : vector<1x128xf32>
    %12 = arith.mulf %3, %11 : vector<1x128xf32>
    %13 = arith.mulf %3, %3 : vector<1x128xf32>
    %c1_6 = arith.constant 1 : index
    %c0_7 = arith.constant 0 : index
    %14 = vector.load %arg0[%c1_6, %c0_7] : memref<15x128xf32, #tpu.memory_space<vmem>>, vector<1x128xf32>
    %c4 = arith.constant 4 : index
    %c0_8 = arith.constant 0 : index
    %15 = vector.load %arg0[%c4, %c0_8] : memref<15x128xf32, #tpu.memory_space<vmem>>, vector<1x128xf32>
    %c0_9 = arith.constant 0 : index
    %c1_10 = arith.constant 1 : index
    %16 = memref.load %arg1[%c0_9, %c1_10] : memref<2x3xf32, #tpu.memory_space<smem>>
    %17 = vector.broadcast %16 : f32 to vector<1x128xf32>
    %c16_i32_11 = arith.constant 16 : i32
    %18 = vector.broadcast %c16_i32_11 : i32 to vector<1x128xi32>
    %19 = arith.cmpi sge, %0, %18 : vector<1x128xi32>
    %c1_12 = arith.constant 1 : index
    %c1_13 = arith.constant 1 : index
    %20 = memref.load %arg1[%c1_12, %c1_13] : memref<2x3xf32, #tpu.memory_space<smem>>
    %21 = vector.broadcast %20 : f32 to vector<1x128xf32>
    %22 = arith.select %19, %21, %17 : vector<1x128xi1>, vector<1x128xf32>
    %23 = arith.subf %14, %22 : vector<1x128xf32>
    %24 = arith.mulf %15, %23 : vector<1x128xf32>
    %25 = arith.mulf %15, %15 : vector<1x128xf32>
    %26 = arith.addf %12, %24 : vector<1x128xf32>
    %27 = arith.addf %13, %25 : vector<1x128xf32>
    %c2 = arith.constant 2 : index
    %c0_14 = arith.constant 0 : index
    %28 = vector.load %arg0[%c2, %c0_14] : memref<15x128xf32, #tpu.memory_space<vmem>>, vector<1x128xf32>
    %c5 = arith.constant 5 : index
    %c0_15 = arith.constant 0 : index
    %29 = vector.load %arg0[%c5, %c0_15] : memref<15x128xf32, #tpu.memory_space<vmem>>, vector<1x128xf32>
    %c0_16 = arith.constant 0 : index
    %c2_17 = arith.constant 2 : index
    %30 = memref.load %arg1[%c0_16, %c2_17] : memref<2x3xf32, #tpu.memory_space<smem>>
    %31 = vector.broadcast %30 : f32 to vector<1x128xf32>
    %c16_i32_18 = arith.constant 16 : i32
    %32 = vector.broadcast %c16_i32_18 : i32 to vector<1x128xi32>
    %33 = arith.cmpi sge, %0, %32 : vector<1x128xi32>
    %c1_19 = arith.constant 1 : index
    %c2_20 = arith.constant 2 : index
    %34 = memref.load %arg1[%c1_19, %c2_20] : memref<2x3xf32, #tpu.memory_space<smem>>
    %35 = vector.broadcast %34 : f32 to vector<1x128xf32>
    %36 = arith.select %33, %35, %31 : vector<1x128xi1>, vector<1x128xf32>
    %37 = arith.subf %28, %36 : vector<1x128xf32>
    %38 = arith.mulf %29, %37 : vector<1x128xf32>
    %39 = arith.mulf %29, %29 : vector<1x128xf32>
    %40 = arith.addf %26, %38 : vector<1x128xf32>
    %41 = arith.addf %27, %39 : vector<1x128xf32>
    %42 = math.rsqrt %41 : vector<1x128xf32>
    %cst = arith.constant 9.99999995E+11 : f32
    %43 = vector.broadcast %cst : f32 to vector<1x128xf32>
    %44 = arith.minimumf %42, %43 : vector<1x128xf32>
    %45 = arith.mulf %40, %44 : vector<1x128xf32>
    %46 = math.absf %45 : vector<1x128xf32>
    %47 = math.sqrt %46 : vector<1x128xf32>
    %48 = arith.subf %1, %47 : vector<1x128xf32>
    %49 = math.absf %48 : vector<1x128xf32>
    %50 = vector.shape_cast %49 : vector<1x128xf32> to vector<1x1x128xf32>
    %cst_21 = arith.constant dense<0.000000e+00> : vector<1xf32>
    %51 = vector.multi_reduction <add>, %50, %cst_21 [1, 2] : vector<1x1x128xf32> to vector<1xf32>
    %52 = vector.shape_cast %51 : vector<1xf32> to vector<1x1x1xf32>
    %53 = vector.extract %52[0, 0, 0] : f32 from vector<1x1x1xf32>
    %cst_22 = arith.constant 3.125000e-02 : f32
    %54 = arith.mulf %53, %cst_22 : f32
    %c8 = arith.constant 8 : index
    %c0_23 = arith.constant 0 : index
    %55 = vector.load %arg0[%c8, %c0_23] : memref<15x128xf32, #tpu.memory_space<vmem>>, vector<1x128xf32>
    %56 = math.absf %55 : vector<1x128xf32>
    %57 = vector.shape_cast %56 : vector<1x128xf32> to vector<1x1x128xf32>
    %cst_24 = arith.constant dense<0.000000e+00> : vector<1xf32>
    %58 = vector.multi_reduction <add>, %57, %cst_24 [1, 2] : vector<1x1x128xf32> to vector<1xf32>
    %59 = vector.shape_cast %58 : vector<1xf32> to vector<1x1x1xf32>
    %60 = vector.extract %59[0, 0, 0] : f32 from vector<1x1x1xf32>
    %cst_25 = arith.constant 3.125000e-02 : f32
    %61 = arith.mulf %60, %cst_25 : f32
    %c9 = arith.constant 9 : index
    %c0_26 = arith.constant 0 : index
    %62 = vector.load %arg0[%c9, %c0_26] : memref<15x128xf32, #tpu.memory_space<vmem>>, vector<1x128xf32>
    %c12 = arith.constant 12 : index
    %c0_27 = arith.constant 0 : index
    %63 = vector.load %arg0[%c12, %c0_27] : memref<15x128xf32, #tpu.memory_space<vmem>>, vector<1x128xf32>
    %64 = arith.mulf %62, %62 : vector<1x128xf32>
    %65 = arith.mulf %63, %63 : vector<1x128xf32>
    %66 = arith.mulf %62, %63 : vector<1x128xf32>
    %c10 = arith.constant 10 : index
    %c0_28 = arith.constant 0 : index
    %67 = vector.load %arg0[%c10, %c0_28] : memref<15x128xf32, #tpu.memory_space<vmem>>, vector<1x128xf32>
    %c13 = arith.constant 13 : index
    %c0_29 = arith.constant 0 : index
    %68 = vector.load %arg0[%c13, %c0_29] : memref<15x128xf32, #tpu.memory_space<vmem>>, vector<1x128xf32>
    %69 = arith.mulf %67, %67 : vector<1x128xf32>
    %70 = arith.mulf %68, %68 : vector<1x128xf32>
    %71 = arith.mulf %67, %68 : vector<1x128xf32>
    %72 = arith.addf %64, %69 : vector<1x128xf32>
    %73 = arith.addf %65, %70 : vector<1x128xf32>
    %74 = arith.addf %66, %71 : vector<1x128xf32>
    %c11 = arith.constant 11 : index
    %c0_30 = arith.constant 0 : index
    %75 = vector.load %arg0[%c11, %c0_30] : memref<15x128xf32, #tpu.memory_space<vmem>>, vector<1x128xf32>
    %c14 = arith.constant 14 : index
    %c0_31 = arith.constant 0 : index
    %76 = vector.load %arg0[%c14, %c0_31] : memref<15x128xf32, #tpu.memory_space<vmem>>, vector<1x128xf32>
    %77 = arith.mulf %75, %75 : vector<1x128xf32>
    %78 = arith.mulf %76, %76 : vector<1x128xf32>
    %79 = arith.mulf %75, %76 : vector<1x128xf32>
    %80 = arith.addf %72, %77 : vector<1x128xf32>
    %81 = arith.addf %73, %78 : vector<1x128xf32>
    %82 = arith.addf %74, %79 : vector<1x128xf32>
    %83 = math.sqrt %80 : vector<1x128xf32>
    %cst_32 = arith.constant 1.000000e+00 : f32
    %84 = vector.broadcast %cst_32 : f32 to vector<1x128xf32>
    %85 = arith.subf %83, %84 : vector<1x128xf32>
    %86 = math.absf %85 : vector<1x128xf32>
    %87 = math.sqrt %81 : vector<1x128xf32>
    %cst_33 = arith.constant 1.000000e+00 : f32
    %88 = vector.broadcast %cst_33 : f32 to vector<1x128xf32>
    %89 = arith.subf %87, %88 : vector<1x128xf32>
    %90 = math.absf %89 : vector<1x128xf32>
    %91 = arith.addf %86, %90 : vector<1x128xf32>
    %92 = math.rsqrt %80 : vector<1x128xf32>
    %93 = math.rsqrt %81 : vector<1x128xf32>
    %94 = arith.mulf %92, %93 : vector<1x128xf32>
    %cst_34 = arith.constant 1.000000e+08 : f32
    %95 = vector.broadcast %cst_34 : f32 to vector<1x128xf32>
    %96 = arith.minimumf %94, %95 : vector<1x128xf32>
    %97 = arith.mulf %82, %96 : vector<1x128xf32>
    %cst_35 = arith.constant 1.000000e+00 : f32
    %98 = vector.broadcast %cst_35 : f32 to vector<1x128xf32>
    %99 = arith.subf %98, %97 : vector<1x128xf32>
    %c16_i32_36 = arith.constant 16 : i32
    %100 = vector.broadcast %c16_i32_36 : i32 to vector<1x128xi32>
    %101 = arith.cmpi slt, %0, %100 : vector<1x128xi32>
    %cst_37 = arith.constant 0.000000e+00 : f32
    %102 = vector.broadcast %cst_37 : f32 to vector<1x128xf32>
    %103 = arith.select %101, %91, %102 : vector<1x128xi1>, vector<1x128xf32>
    %cst_38 = arith.constant 0.000000e+00 : f32
    %104 = vector.broadcast %cst_38 : f32 to vector<1x128xf32>
    %105 = arith.select %101, %99, %104 : vector<1x128xi1>, vector<1x128xf32>
    %106 = vector.shape_cast %103 : vector<1x128xf32> to vector<1x1x128xf32>
    %cst_39 = arith.constant dense<0.000000e+00> : vector<1xf32>
    %107 = vector.multi_reduction <add>, %106, %cst_39 [1, 2] : vector<1x1x128xf32> to vector<1xf32>
    %108 = vector.shape_cast %107 : vector<1xf32> to vector<1x1x1xf32>
    %109 = vector.extract %108[0, 0, 0] : f32 from vector<1x1x1xf32>
    %cst_40 = arith.constant 3.125000e-02 : f32
    %110 = arith.mulf %109, %cst_40 : f32
    %111 = vector.shape_cast %105 : vector<1x128xf32> to vector<1x1x128xf32>
    %cst_41 = arith.constant dense<0.000000e+00> : vector<1xf32>
    %112 = vector.multi_reduction <add>, %111, %cst_41 [1, 2] : vector<1x1x128xf32> to vector<1xf32>
    %113 = vector.shape_cast %112 : vector<1xf32> to vector<1x1x1xf32>
    %114 = vector.extract %113[0, 0, 0] : f32 from vector<1x1x1xf32>
    %cst_42 = arith.constant 6.250000e-02 : f32
    %115 = arith.mulf %114, %cst_42 : f32
    %cst_43 = arith.constant 1.000000e-01 : f32
    %116 = arith.mulf %cst_43, %110 : f32
    %117 = arith.addf %54, %116 : f32
    %cst_44 = arith.constant 1.000000e-01 : f32
    %118 = arith.mulf %cst_44, %61 : f32
    %119 = arith.addf %117, %118 : f32
    %cst_45 = arith.constant 1.000000e-01 : f32
    %120 = arith.mulf %cst_45, %115 : f32
    %121 = arith.addf %119, %120 : f32
    %122 = tpu.iota {dimensions = array<i32: 1>} : vector<1x128xi32>
    %cst_46 = arith.constant 0.000000e+00 : f32
    %123 = vector.broadcast %cst_46 : f32 to vector<1x128xf32>
    %c0_i32 = arith.constant 0 : i32
    %124 = vector.broadcast %c0_i32 : i32 to vector<1x128xi32>
    %125 = arith.cmpi eq, %122, %124 : vector<1x128xi32>
    %126 = vector.broadcast %121 : f32 to vector<1x128xf32>
    %127 = arith.select %125, %126, %123 : vector<1x128xi1>, vector<1x128xf32>
    %c1_i32 = arith.constant 1 : i32
    %128 = vector.broadcast %c1_i32 : i32 to vector<1x128xi32>
    %129 = arith.cmpi eq, %122, %128 : vector<1x128xi32>
    %130 = vector.broadcast %54 : f32 to vector<1x128xf32>
    %131 = arith.select %129, %130, %127 : vector<1x128xi1>, vector<1x128xf32>
    %c2_i32 = arith.constant 2 : i32
    %132 = vector.broadcast %c2_i32 : i32 to vector<1x128xi32>
    %133 = arith.cmpi eq, %122, %132 : vector<1x128xi32>
    %134 = vector.broadcast %61 : f32 to vector<1x128xf32>
    %135 = arith.select %133, %134, %131 : vector<1x128xi1>, vector<1x128xf32>
    %c3_i32 = arith.constant 3 : i32
    %136 = vector.broadcast %c3_i32 : i32 to vector<1x128xi32>
    %137 = arith.cmpi eq, %122, %136 : vector<1x128xi32>
    %138 = vector.broadcast %110 : f32 to vector<1x128xf32>
    %139 = arith.select %137, %138, %135 : vector<1x128xi1>, vector<1x128xf32>
    %c4_i32 = arith.constant 4 : i32
    %140 = vector.broadcast %c4_i32 : i32 to vector<1x128xi32>
    %141 = arith.cmpi eq, %122, %140 : vector<1x128xi32>
    %142 = vector.broadcast %115 : f32 to vector<1x128xf32>
    %143 = arith.select %141, %142, %139 : vector<1x128xi1>, vector<1x128xf32>
    %c0_47 = arith.constant 0 : index
    %c0_48 = arith.constant 0 : index
    %144 = vector.load %arg2[%c0_47, %c0_48] : memref<1x128xf32, #tpu.memory_space<vmem>>, vector<1x128xf32>
    tpu.vector_store %arg2[%c0_47, %c0_48], %143 {strides = array<i32>} : memref<1x128xf32, #tpu.memory_space<vmem>>, vector<1x128xf32>,
    return
  }
}

</mosaic_0001>

<bundles_post_ra>
// kernel: tpu_custom_call.1
= control target key start
LH: loop header
LB: loop body
LE: loop exit
PB: predicated region body
PF: predicated region fallthrough
CT: control target
= control target key end

     0   :  { %7 = vsyncpa [#allocation3], 0  ;;  %s380_s0 = inlined_call_operand.hbm [shape: f32[15,128], index: 0, kind: input, shape index: {}]   ;;  %s381_s1 = inlined_call_operand.vmem [shape: f32[2,3], index: 1, kind: input, shape index: {}]   ;;  %s382_s2 = inlined_call_operand.hbm [shape: f32[1,128], index: 2, kind: output, shape index: {}]  }
   0x1   :  { %8 = vsyncpa [#allocation5], 0 }
   0x2   :  { %9 = vsyncpa [#allocation4], 0  ;;  %s314_s9 = smov [#allocation2]   ;;  %s28_s13 = sshll.u32 %s381_s1, 4  ;;  %s29_s13 = int_to_ptr.vmem [resolvable:$true] %s28_s13 }
   0x3   :  { %s15_s10 = sshll.u32 %s314_s9, 4  ;;  %s252_s16 = scalar_lea.hbm %s380_s0, 256  ;;  %s16_s10 = int_to_ptr.vmem [resolvable:$true] %s15_s10 }
   0x4   :  { %p253_p0 = scmp.ne.s32.totalorder %s380_s0, %s252_s16  ;;  %p256_p1 = scmp.lt.u32.totalorder %s252_s16, %s380_s0 }
   0x6   :  { %p258_p2 = pnand %p256_p1, %p253_p0 }
   0x8   :  { %261 = shalt.err (!%p258_p2)
}
   0x9   :  { %s262_s21 = scalar_lea.vmem %s16_s10, 256  ;;  %p267_p4 = scmp.lt.s32.totalorder %s16_s10, %s16_s10 }
   0xa   :  { %p263_p3 = scmp.ne.s32.totalorder %s16_s10, %s262_s21  ;;  %p268_p5 = scmp.lt.s32.totalorder %s262_s21, %s262_s21 }
   0xc   :  { %p269_p6 = por %p268_p5, %p267_p4 }
   0xe   :  { %p270_p7 = pnand %p269_p6, %p263_p3 }
  0x10   :  { %273 = shalt.err (!%p270_p7)
}
  0x11   :  { %s315_s1 = smov 128   ;;  %s316_s22 = smov 8  }
  0x12   :  { %21 = dma.hbm_to_vmem [thread:$0]  %s380_s0, 256, %s16_s10, [#allocation3], %s315_s1, %s315_s1, %s316_s22  }
  0x13   :  { %s274_s25 = scalar_lea.vmem %s29_s13, 32  ;;  %p279_p9 = scmp.lt.s32.totalorder %s29_s13, %s29_s13 }
  0x14   :  { %p275_p8 = scmp.ne.s32.totalorder %s29_s13, %s274_s25  ;;  %p280_p10 = scmp.lt.s32.totalorder %s274_s25, %s274_s25 }
  0x16   :  { %p281_p11 = por %p280_p10, %p279_p9 }
  0x18   :  { %p282_p12 = pnand %p281_p11, %p275_p8 }
  0x1a   :  { %285 = shalt.err (!%p282_p12)
}
  0x1b   :  { %s317_s26 = smov [#allocation6]  }
  0x1c   :  { %31 = dma.vmem_to_smem %s29_s13, 32, %s317_s26, [#allocation5]  }
  0x1d   :  { %308 = dma.done.wait [#allocation3], 256  }
  0x1e   :  { %309 = vsyncadd [#allocation3], 4294967040 }
  0x1f   :  { %310 = dma.done.wait [#allocation5], 32  }
  0x20   :  { %311 = vsyncadd [#allocation5], 4294967264 }
  0x21   :  { %38 = sfence }
  0x22   :  { %v39_v0 = vlaneseq  ;;  %v115_v1 = vld [vmem:[#allocation2 + $0x9] sm:$0x1]  ;;  %v116_v2 = vld [vmem:[#allocation2 + $0xc] sm:$0x1]  ;;  %v120_v5 = vld [vmem:[#allocation2 + $0xa] sm:$0x1] }
  0x23   :  { %v117_v3 = vmul.f32 %v115_v1, %v115_v1  ;;  %v118_v4 = vmul.f32 %v116_v2, %v116_v2  ;;  %v121_v6 = vld [vmem:[#allocation2 + $0xd] sm:$0x1]  ;;  %v128_v7 = vld [vmem:[#allocation2 + $0xb] sm:$0x1]  ;;  %v122_v8 = vmul.f32 %v120_v5, %v120_v5  ;;  %v129_v10 = vld [vmem:[#allocation2 + $0xe] sm:$0x1]  ;;  %v119_v29 = vmul.f32 %v116_v2, %v115_v1 }
  0x24   :  { %v123_v9 = vmul.f32 %v121_v6, %v121_v6  ;;  %v130_v11 = vmul.f32 %v128_v7, %v128_v7  ;;  %v131_v12 = vmul.f32 %v129_v10, %v129_v10  ;;  %v43_v13 = vld [vmem:[#allocation2 + $0x3] sm:$0x1]  ;;  %s44_s0 = sld [smem:[#allocation6]]  ;;  %v349_v14 = vand.u32 127, %v39_v0  ;;  %v54_v17 = vld [vmem:[#allocation2 + $0x4] sm:$0x1] }
  0x25   :  { %v125_v15 = vadd.f32 %v122_v8, %v117_v3  ;;  %s224_s27 = sld [smem:[#allocation6 + $0x80]]  ;;  %s225_s28 = sld [smem:[#allocation6 + $0x1]]  ;;  %v52_v20 = vmul.f32 %v43_v13, %v43_v13  ;;  %v62_v21 = vmul.f32 %v54_v17, %v54_v17  ;;  %v66_v22 = vld [vmem:[#allocation2 + $0x5] sm:$0x1]  ;;  %v42_v24 = vld [vmem:[#allocation2] sm:$0x1]  ;;  %v124_v33 = vmul.f32 %v121_v6, %v120_v5 }
  0x26   :  { %v126_v16 = vadd.f32 %v123_v9, %v118_v4  ;;  %s226_s29 = sld [smem:[#allocation6 + $0x81]]  ;;  %s227_s30 = sld [smem:[#allocation6 + $0x2]]  ;;  %vm46_vm0 = vcmp.ge.s32.totalorder %v349_v14, 16  ;;  %v74_v23 = vmul.f32 %v66_v22, %v66_v22  ;;  %v53_v27 = vld [vmem:[#allocation2 + $0x1] sm:$0x1]  ;;  %v132_v46 = vmul.f32 %v129_v10, %v128_v7 }
  0x27   :  { %v133_v18 = vadd.f32 %v130_v11, %v125_v15  ;;  %s228_s3 = sld [smem:[#allocation6 + $0x82]]  ;;  %v64_v28 = vadd.f32 %v62_v21, %v52_v20  ;;  %v65_v36 = vld [vmem:[#allocation2 + $0x2] sm:$0x1]  ;;  %v127_v45 = vadd.f32 %v124_v33, %v119_v29  ;;  %vm161_vm5 = vcmp.lt.s32.totalorder %v349_v14, 16  ;;  %v102_v21 = vld [vmem:[#allocation2 + $0x8] sm:$0x1] }
  0x28   :  { %v134_v19 = vadd.f32 %v131_v12, %v126_v16  ;;  %vm90_vm6 = vcmask 1040384   ;;  %vm192_vm9 = vcmp.eq.s32.totalorder %v349_v14, 0  ;;  %vm195_vm10 = vcmp.eq.s32.totalorder %v349_v14, 1  ;;  %s318_s18 = smov [#allocation7]  }
  0x29   :  { %244 = vrsqrt.f32 %v133_v18  ;;  %v76_v38 = vadd.f32 %v74_v23, %v64_v28  ;;  %vm138_vm1 = vcmp.eq.f32.partialorder %v133_v18, inf  ;;  %vm140_vm2 = vcmp.eq.f32.partialorder %v133_v18, 0.0  ;;  %s214_s19 = sshll.u32 %s318_s18, 4  ;;  %s215_s19 = int_to_ptr.vmem [resolvable:$true] %s214_s19 }
  0x2a   :  { %246 = vrsqrt.f32 %v134_v19  ;;  %v45_v25 = vstv %s44_s0  ;;  %v141_v48 = vand.u32 2147483648, %v133_v18  ;;  %vm147_vm3 = vcmp.eq.f32.partialorder %v134_v19, inf  ;;  %s286_s20 = scalar_lea.vmem %s215_s19, 16  ;;  %s290_s21 = scalar_lea.vmem %s215_s19, 32 }
  0x2b   :  { %v48_v26 = vstv %s224_s27  ;;  %v56_v31 = vstv %s225_s28  ;;  %248 = vrsqrt.f32 %v76_v38  ;;  %v150_v51 = vand.u32 2147483648, %v134_v19  ;;  %p287_p13 = scmp.ne.s32.totalorder %s215_s19, %s286_s20  ;;  %p291_p0 = scmp.lt.s32.totalorder %s215_s19, %s215_s19 }
  0x2c   :  { %v49_v30 = vsel %vm46_vm0, %v48_v26, %v45_v25  ;;  %v58_v32 = vstv %s226_s29  ;;  %v68_v37 = vstv %s227_s30  ;;  %vm149_vm4 = vcmp.eq.f32.partialorder %v134_v19, 0.0  ;;  %p292_p1 = scmp.lt.s32.totalorder %s290_s21, %s286_s20 }
  0x2d   :  { %v50_v34 = vsub.f32 %v42_v24, %v49_v30  ;;  %v59_v35 = vsel %vm46_vm0, %v58_v32, %v56_v31  ;;  %v70_v40 = vstv %s228_s3  ;;  %v135_v55 = vadd.f32 %v132_v46, %v127_v45 }
  0x2e   :  { %v60_v39 = vsub.f32 %v53_v27, %v59_v35  ;;  %v71_v41 = vsel %vm46_vm0, %v70_v40, %v68_v37  ;;  %v103_v24 = vand.u32 2147483647, %v102_v21  ;;  %vm198_vm11 = vcmp.eq.s32.totalorder %v349_v14, 2  ;;  %p293_p2 = por %p292_p1, %p291_p0 }
  0x2f   :  { %v51_v42 = vmul.f32 %v50_v34, %v43_v13  ;;  %v72_v44 = vsub.f32 %v65_v36, %v71_v41  ;;  %vm201_vm12 = vcmp.eq.s32.totalorder %v349_v14, 3  ;;  %vm204_vm13 = vcmp.eq.s32.totalorder %v349_v14, 4 }
  0x30   :  { %v61_v43 = vmul.f32 %v60_v39, %v54_v17  ;;  %v104_v26 = vsel %vm90_vm6, %v103_v24, 0.0  ;;  %p294_p3 = pnand %p293_p2, %p287_p13 }
  0x31   :  { %v73_v53 = vmul.f32 %v72_v44, %v66_v22 }
  0x32   :  { %v63_v52 = vadd.f32 %v61_v43, %v51_v42 }
  0x33   :  { %v245_v47 = vpop.eup %244 }
  0x34   :  { %v247_v49 = vpop.eup %246  ;;  %v137_v50 = vmul.f32 %v245_v47, %v133_v18  ;;  %v75_v63 = vadd.f32 %v73_v53, %v63_v52 }
  0x35   :  { %v146_v54 = vmul.f32 %v247_v49, %v134_v19  ;;  %v157_v56 = vmul.f32 %v247_v49, %v245_v47  ;;  %v249_v0 = vpop.eup %248 }
  0x36   :  { %v139_v57 = vsel %vm138_vm1, %v133_v18, %v137_v50  ;;  %v78_v4 = vmin.f32 %v249_v0, 1e+12  ;;  %v41_v18 = vld [vmem:[#allocation2 + $0x7] sm:$0x1] }
  0x37   :  { %v142_v58 = vsel %vm140_vm2, %v141_v48, %v139_v57  ;;  %v148_v59 = vsel %vm147_vm3, %v134_v19, %v146_v54  ;;  %v158_v60 = vmin.f32 %v157_v56, 1e+08 }
  0x38   :  { %v229_v61 = vadd.f32 -1.0, %v142_v58  ;;  %v151_v62 = vsel %vm149_vm4, %v150_v51, %v148_v59  ;;  %v79_v7 = vmul.f32 %v78_v4, %v75_v63 }
  0x39   :  { %v230_v1 = vadd.f32 -1.0, %v151_v62  ;;  %v159_v2 = vmul.f32 %v158_v60, %v135_v55 }
  0x3a   :  { %v144_v3 = vand.u32 2147483647, %v229_v61  ;;  %v80_v9 = vand.u32 2147483647, %v79_v7 }
  0x3b   :  { %v153_v5 = vand.u32 2147483647, %v230_v1  ;;  %v160_v6 = vsub.f32 1.0, %v159_v2 }
  0x3c   :  { %250 = vrsqrt.f32 %v80_v9  ;;  %vm83_vm7 = vcmp.eq.f32.partialorder %v80_v9, inf  ;;  %v86_v16 = vand.u32 2147483648, %v80_v9  ;;  %vm85_vm8 = vcmp.eq.f32.partialorder %v80_v9, 0.0 }
  0x3d   :  { %v154_v8 = vadd.f32 %v153_v5, %v144_v3  ;;  %v163_v11 = vsel %vm161_vm5, %v160_v6, 0.0 }
  0x3e   :  { %v175_v13 = vsel %vm90_vm6, %v163_v11, 0.0 }
  0x3f   :  { %v162_v10 = vsel %vm161_vm5, %v154_v8, 0.0 }
  0x40   :  { %v164_v12 = vsel %vm90_vm6, %v162_v10, 0.0 }
  0x41   :  { %165 = vadd.xlane.f32.xlu1 %v164_v12 }
  0x45   :  { %176 = vadd.xlane.f32.xlu1 %v175_v13 }
  0x46   :  { %v251_v15 = vpop.eup %250 }
  0x47   :  { %v82_v17 = vmul.f32 %v251_v15, %v80_v9 }
  0x49   :  { %v84_v19 = vsel %vm83_vm7, %v80_v9, %v82_v17 }
  0x4a   :  { %v87_v20 = vsel %vm85_vm8, %v86_v16, %v84_v19 }
  0x4b   :  { %v88_v22 = vsub.f32 %v41_v18, %v87_v20 }
  0x4d   :  { %v89_v23 = vand.u32 2147483647, %v88_v22 }
  0x4f   :  { %v91_v25 = vsel %vm90_vm6, %v89_v23, 0.0 }
  0x50   :  { %92 = vadd.xlane.f32.xlu0 %v91_v25 }
  0x54   :  { %105 = vadd.xlane.f32.xlu0 %v104_v26 }
  0xce   :  { %v166_v27 = vpop.xlane.xlu1 %165 }
  0xcf   :  { %v167_v29 = vrot.slane %v166_v27, 4 }
  0xd1   :  { %v168_v31 = vadd.f32 %v167_v29, %v166_v27 }
  0xd2   :  { %v177_v28 = vpop.xlane.xlu1 %176 }
  0xd3   :  { %v178_v30 = vrot.slane %v177_v28, 4  ;;  %v169_v36 = vrot.slane %v168_v31, 2 }
  0xd5   :  { %v179_v34 = vadd.f32 %v178_v30, %v177_v28  ;;  %v170_v43 = vadd.f32 %v169_v36, %v168_v31 }
  0xd7   :  { %v180_v39 = vrot.slane %v179_v34, 2  ;;  %v171_v49 = vrot.slane %v170_v43, 1 }
  0xd9   :  { %v181_v44 = vadd.f32 %v180_v39, %v179_v34  ;;  %v172_v53 = vadd.f32 %v171_v49, %v170_v43 }
  0xdb   :  { %v182_v51 = vrot.slane %v181_v44, 1 }
  0xdd   :  { %v93_v32 = vpop.xlane.xlu0 %92  ;;  %v183_v54 = vadd.f32 %v182_v51, %v181_v44 }
  0xde   :  { %v94_v33 = vrot.slane %v93_v32, 4 }
  0xe0   :  { %v95_v35 = vadd.f32 %v94_v33, %v93_v32 }
  0xe1   :  { %v106_v37 = vpop.xlane.xlu0 %105 }
  0xe2   :  { %v96_v38 = vrot.slane %v95_v35, 2  ;;  %v107_v40 = vrot.slane %v106_v37, 4 }
  0xe4   :  { %v108_v41 = vadd.f32 %v107_v40, %v106_v37  ;;  %v97_v42 = vadd.f32 %v96_v38, %v95_v35 }
  0xe6   :  { %v109_v45 = vrot.slane %v108_v41, 2  ;;  %v98_v46 = vrot.slane %v97_v42, 1 }
  0xe8   :  { %v110_v47 = vadd.f32 %v109_v45, %v108_v41  ;;  %v99_v48 = vadd.f32 %v98_v46, %v97_v42 }
  0xea   :  { %231 = vpush %v99_v48  ;;  %v111_v50 = vrot.slane %v110_v47, 1 }
  0xec   :  { %v112_v52 = vadd.f32 %v111_v50, %v110_v47 }
  0xee   :  { %233 = vpush %v112_v52 }
  0xef   :  { %235 = vpush %v172_v53 }
  0xf0   :  { %237 = vpush %v183_v54 }
 0x11b   :  { %s232_s4 = spop %231 }
 0x11c   :  { %s101_s10 = smul.f32 0.03125, %s232_s4 }
 0x11e   :  { %v196_v56 = vstv %s101_s10 }
 0x11f   :  { %s234_s5 = spop %233 }
 0x120   :  { %s114_s6 = smul.f32 0.03125, %s234_s5  ;;  %s236_s7 = spop %235 }
 0x121   :  { %s174_s8 = smul.f32 0.03125, %s236_s7  ;;  %s238_s9 = spop %237 }
 0x122   :  { %s185_s12 = smul.f32 0.0625, %s238_s9  ;;  %v199_v58 = vstv %s114_s6 }
 0x123   :  { %s186_s11 = smul.f32 0.1, %s174_s8  ;;  %v202_v60 = vstv %s174_s8 }
 0x124   :  { %s188_s13 = smul.f32 0.1, %s114_s6  ;;  %v205_v62 = vstv %s185_s12 }
 0x125   :  { %s187_s14 = sadd.f32 %s186_s11, %s101_s10  ;;  %s190_s16 = smul.f32 0.1, %s185_s12 }
 0x127   :  { %s189_s15 = sadd.f32 %s188_s13, %s187_s14 }
 0x129   :  { %s191_s17 = sadd.f32 %s190_s16, %s189_s15 }
 0x12b   :  { %v193_v55 = vstv %s191_s17 }
 0x12c   :  { %v194_v57 = vsel %vm192_vm9, %v193_v55, 0.0 }
 0x12d   :  { %v197_v59 = vsel %vm195_vm10, %v196_v56, %v194_v57 }
 0x12e   :  { %v200_v61 = vsel %vm198_vm11, %v199_v58, %v197_v59 }
 0x12f   :  { %v203_v63 = vsel %vm201_vm12, %v202_v60, %v200_v61 }
 0x130   :  { %v206_v0 = vsel %vm204_vm13, %v205_v62, %v203_v63 }
 0x131   :  { %207 = vst [vmem:[#allocation7] sm:$0x1] %v206_v0 }
 0x132   :  { %297 = shalt.err (!%p294_p3)
}
 0x133   :  { %s298_s23 = scalar_lea.hbm %s382_s2, 16 }
 0x134   :  { %p299_p4 = scmp.ne.s32.totalorder %s382_s2, %s298_s23  ;;  %p302_p5 = scmp.lt.u32.totalorder %s298_s23, %s382_s2 }
 0x136   :  { %p304_p6 = pnand %p302_p5, %p299_p4 }
 0x138   :  { %307 = shalt.err (!%p304_p6)
}
 0x139   :  { %217 = dma.vmem_to_hbm [thread:$0]  %s215_s19, 16, %s382_s2, [#allocation4]  }
 0x13a   :  { %312 = dma.done.wait [#allocation4], 16  }
 0x13b   :  { %313 = vsyncadd [#allocation4], 4294967280 }
 0x13c   :  { %221 = vsyncpa [#allocation3], 1 }
 0x13d   :  { %222 = vsyncpa [#allocation4], 1 }
 0x13e   :  { %223 = vsyncpa [#allocation5], 1 }

</bundles_post_ra>
